<compile_context>
chip_gen: v7x
topology: tpu7x:2x2x1
jax: 0.10.0
libtpu: 0.0.40
codegen_flags: <defaults>
</compile_context>

<pallas_src>
import jax
import jax.numpy as jnp
from jax.experimental import pallas as pl
from jax.experimental.pallas import tpu as pltpu


def _patch_embed_kernel(x_ref, w_ref, o_ref):
    # x_ref: (tm, K) in the input dtype, w_ref: (K, E) weight dtype (resident
    # across all grid steps), o_ref: (tm, E) weight dtype.
    x = x_ref[...].astype(w_ref.dtype)  # in-kernel cast; hides under the MXU
    o_ref[...] = jnp.dot(
        x, w_ref[...], preferred_element_type=jnp.float32
    ).astype(o_ref.dtype)


def _round_up(x, m):
    return ((x + m - 1) // m) * m


# Tile-byte budget (double-buffered x/out tiles + resident weight) that fits
# comfortably on every generation, and the scoped-VMEM limit we request.
_TILE_VMEM_BUDGET = 28 * 1024 * 1024
_VMEM_LIMIT_BYTES = 34 * 1024 * 1024


def patch_embed_matmul(x, w_t, out_dtype):
    """x: (N, K) float array, w_t: (K, E) weight -> (N, E) in out_dtype."""
    N, K = x.shape
    Kw, E = w_t.shape
    assert K == Kw, (K, Kw)

    x_b = jnp.dtype(x.dtype).itemsize
    w_b = jnp.dtype(w_t.dtype).itemsize
    o_b = jnp.dtype(out_dtype).itemsize

    def tile_bytes(tm):
        # 2 buffers for the x tile and the out tile; budget 2 for the weight
        # even though its constant index_map means it is only fetched once.
        return 2 * (tm * K * x_b + tm * E * o_b + K * E * w_b)

    tm = 8
    for cand in (1024, 512, 256, 128, 64, 32, 16, 8):
        if tile_bytes(cand) <= _TILE_VMEM_BUDGET:
            tm = cand
            break
    tm = min(tm, _round_up(max(N, 1), 8))
    # TODO(synk): if K*E ever grows beyond VMEM residency, add an E-tiling path.

    grid = (pl.cdiv(N, tm),)

    cost = pl.CostEstimate(
        flops=2 * N * K * E,
        transcendentals=0,
        bytes_accessed=N * K * x_b + K * E * w_b + N * E * o_b,
    )

    return pl.pallas_call(
        _patch_embed_kernel,
        out_shape=jax.ShapeDtypeStruct((N, E), out_dtype),
        grid_spec=pltpu.PrefetchScalarGridSpec(
            num_scalar_prefetch=0,
            grid=grid,
            in_specs=[
                # Activation: one (tm, K) tile per step; K block == full K so
                # no K padding is needed (last-dim rule satisfied).
                pl.BlockSpec((tm, K), lambda i: (i, 0)),
                # Weight: constant index_map -> fetched once, VMEM-resident.
                pl.BlockSpec((K, E), lambda i: (0, 0)),
            ],
            out_specs=pl.BlockSpec((tm, E), lambda i: (i, 0)),
        ),
        compiler_params=pltpu.CompilerParams(
            dimension_semantics=("parallel",),
            vmem_limit_bytes=_VMEM_LIMIT_BYTES,
        ),
        cost_estimate=cost,
    )(x, w_t)


def qwen2_5_vision_patch_embed(
    hidden_states,
    weight,
    *,
    patch_size: int = 14,
    temporal_patch_size: int = 2,
    in_channels: int = 3,
):
    """Forward of Qwen2_5_VisionPatchEmbed.

    hidden_states: any shape that flattens to (-1, C*T*P*P)
    weight:        (embed_dim, in_channels, temporal_patch_size, patch, patch)
    returns:       (num_patches, embed_dim) in the weight's dtype
    """
    embed_dim = weight.shape[0]
    K = in_channels * temporal_patch_size * patch_size * patch_size
    target_dtype = weight.dtype

    # No wrapper-side activation cast: the kernel casts per-tile.
    x = hidden_states.reshape(-1, K)
    # One-time small weight reshape/transpose in the wrapper (kept out of the
    # kernel so no per-tile XLU transposes).
    w_t = weight.reshape(embed_dim, K).T.astype(target_dtype)  # (K, E)

    return patch_embed_matmul(x, w_t, target_dtype)


if __name__ == "__main__":
    # Small shapes consistent with the module (scaled-down Qwen2.5-VL patcher).
    key = jax.random.PRNGKey(0)
    k1, k2 = jax.random.split(key)

    patch_size = 4
    temporal_patch_size = 2
    in_channels = 3
    embed_dim = 32
    num_patches = 8
    K = in_channels * temporal_patch_size * patch_size * patch_size  # 96

    hidden_states = jax.random.normal(k1, (num_patches, K), dtype=jnp.float32)
    weight = (
        jax.random.normal(
            k2,
            (embed_dim, in_channels, temporal_patch_size, patch_size, patch_size),
            dtype=jnp.float32,
        )
        * 0.02
    ).astype(jnp.bfloat16)  # real model runs the projection in bf16

    out = qwen2_5_vision_patch_embed(
        hidden_states,
        weight,
        patch_size=patch_size,
        temporal_patch_size=temporal_patch_size,
        in_channels=in_channels,
    )
    out = jax.block_until_ready(out)

    # Reference: .to(bf16) then stride-equal Conv3d == bf16 matmul on flattened
    # patches with f32 accumulation.
    x_bf16 = hidden_states.reshape(-1, K).astype(jnp.bfloat16)
    w_flat = weight.reshape(embed_dim, K)
    ref = jnp.dot(
        x_bf16.astype(jnp.float32),
        w_flat.astype(jnp.float32).T,
        precision=jax.lax.Precision.HIGHEST,
    ).astype(jnp.bfloat16)

    assert out.shape == (num_patches, embed_dim), out.shape
    assert out.dtype == jnp.bfloat16, out.dtype
    assert jnp.allclose(
        out.astype(jnp.float32), ref.astype(jnp.float32), rtol=2e-2, atol=2e-2
    ), "mismatch vs reference"

    print("KERNEL_OK")
</pallas_src>

<mosaic_0001>
module attributes {stable_mosaic.version = 11 : i64} {
  func.func @_patch_embed_kernel(%arg0: i32, %arg1: memref<8x96xf32, #tpu.memory_space<vmem>>, %arg2: memref<96x32xbf16, #tpu.memory_space<vmem>>, %arg3: memref<8x32xbf16, #tpu.memory_space<vmem>>) attributes {dimension_semantics = [#tpu.dimension_semantics<parallel>], iteration_bounds = array<i64: 1>, scalar_prefetch = 0 : i64, scratch_operands = 0 : i64, tpu.core_type = #tpu.core_type<tc>, window_params = [{transform_indices = @transform_0, window_bounds = array<i64: 8, 96>}, {pipeline_mode = #tpu.pipeline_mode<synchronous>, transform_indices = @transform_1, window_bounds = array<i64: 96, 32>}, {transform_indices = @transform_2, window_bounds = array<i64: 8, 32>}]} {
    %c0 = arith.constant 0 : index
    %c0_0 = arith.constant 0 : index
    %0 = vector.load %arg1[%c0, %c0_0] : memref<8x96xf32, #tpu.memory_space<vmem>>, vector<8x96xf32>
    %1 = arith.truncf %0 : vector<8x96xf32> to vector<8x96xbf16>
    %c0_1 = arith.constant 0 : index
    %c0_2 = arith.constant 0 : index
    %2 = vector.load %arg2[%c0_1, %c0_2] : memref<96x32xbf16, #tpu.memory_space<vmem>>, vector<96x32xbf16>
    %cst = arith.constant dense<0.000000e+00> : vector<8x32xf32>
    %3 = tpu.matmul %1, %2, %cst {dimension_numbers = #tpu.dot_dimension_numbers<[1], [0], [0], [1], [0, 0, 1, 1], [], []>} : vector<8x96xbf16>, vector<96x32xbf16>, vector<8x32xf32> -> vector<8x32xf32>
    %4 = arith.truncf %3 : vector<8x32xf32> to vector<8x32xbf16>
    %c0_3 = arith.constant 0 : index
    %c0_4 = arith.constant 0 : index
    %5 = vector.load %arg3[%c0_3, %c0_4] : memref<8x32xbf16, #tpu.memory_space<vmem>>, vector<8x32xbf16>
    tpu.vector_store %arg3[%c0_3, %c0_4], %4 {strides = array<i32>} : memref<8x32xbf16, #tpu.memory_space<vmem>>, vector<8x32xbf16>,
    return
  }
  func.func @transform_0(%arg0: i32) -> (i32, i32) {
    %c0_i32 = arith.constant 0 : i32
    %c0_i32_0 = arith.constant 0 : i32
    return %arg0, %c0_i32 : i32, i32
  }
  func.func @transform_1(%arg0: i32) -> (i32, i32) {
    %c0_i32 = arith.constant 0 : i32
    %c0_i32_0 = arith.constant 0 : i32
    %c0_i32_1 = arith.constant 0 : i32
    return %c0_i32, %c0_i32_0 : i32, i32
  }
  func.func @transform_2(%arg0: i32) -> (i32, i32) {
    %c0_i32 = arith.constant 0 : i32
    %c0_i32_0 = arith.constant 0 : i32
    return %arg0, %c0_i32 : i32, i32
  }
}

</mosaic_0001>

<bundles_post_ra>
// kernel: tpu_custom_call.1
= control target key start
LH: loop header
LB: loop body
LE: loop exit
PB: predicated region body
PF: predicated region fallthrough
CT: control target
= control target key end

     0   :  { %v187_v1 = vmov 0.0   ;;  %vm188_vm0 = vmmov 0   ;;  %s238_s0 = inlined_call_operand.vmem [shape: f32[8,96], index: 0, kind: input, shape index: {}]   ;;  %s239_s1 = inlined_call_operand.vmem [shape: bf16[96,32], index: 1, kind: input, shape index: {}]   ;;  %s240_s2 = inlined_call_operand.hbm [shape: bf16[8,32], index: 2, kind: output, shape index: {}]  }
   0x1   :  { %v157_v0 = vld [vmem:[%s239_s1] sm:$0xff]   ;;  %138 = vmatprep.subr.bf16.mxu0 %v187_v1  ;;  %v158_v2 = vld [vmem:[%s239_s1 + $0x8] sm:$0xff]   ;;  %150 = vmatprep.mubr.msk.bf16.mxu0 %vm188_vm0, %v187_v1  ;;  %v159_v3 = vld [vmem:[%s239_s1 + $0x10] sm:$0xff]  }
   0x2   :  { %139 = vmatpush3.bf16.msra.mxu0 %v157_v0 }
   0x3   :  { %140 = vmatprep.subr.bf16.mxu0 %v187_v1 }
   0x6   :  { %141 = vmatpush3.bf16.msra.mxu0 %v158_v2 }
   0x7   :  { %7 = vsyncpa [#allocation3], 0  ;;  %142 = vmatprep.subr.bf16.mxu0 %v187_v1  ;;  %v160_v4 = vld [vmem:[%s239_s1 + $0x18] sm:$0xff]   ;;  %v161_v5 = vld [vmem:[%s239_s1 + $0x20] sm:$0xff]   ;;  %vm63_vm1 = vcmask 785408   ;;  %s189_s23 = smov [#allocation2]  }
   0x8   :  { %v162_v6 = vld [vmem:[%s239_s1 + $0x28] sm:$0xff]   ;;  %v13_v7 = vld [vmem:[%s238_s0] sm:$0xff]  ;;  %s116_s24 = sshll.u32 %s189_s23, 4  ;;  %vm108_vm2 = vcmask 257024   ;;  %s117_s24 = int_to_ptr.vmem [resolvable:$true] %s116_s24 }
   0x9   :  { %v14_v8 = vpack.c.bf16 %v13_v7, %v13_v7  ;;  %s163_s1 = scalar_lea.vmem %s117_s24, 64  ;;  %p168_p1 = scmp.lt.s32.totalorder %s117_s24, %s117_s24 }
   0xa   :  { %143 = vmatpush3.bf16.msra.mxu0 %v159_v3  ;;  %p164_p0 = scmp.ne.s32.totalorder %s117_s24, %s163_s1  ;;  %p169_p2 = scmp.lt.s32.totalorder %s163_s1, %s163_s1 }
   0xb   :  { %144 = vmatprep.subr.bf16.mxu0 %v187_v1 }
   0xc   :  { %p170_p3 = por %p169_p2, %p168_p1 }
   0xe   :  { %145 = vmatpush3.bf16.msra.mxu0 %v160_v4  ;;  %p171_p4 = pnand %p170_p3, %p164_p0 }
   0xf   :  { %146 = vmatprep.subr.bf16.mxu0 %v187_v1 }
  0x12   :  { %147 = vmatpush3.bf16.msra.mxu0 %v161_v5 }
  0x13   :  { %148 = vmatprep.subr.bf16.mxu0 %v187_v1 }
  0x16   :  { %149 = vmatpush3.bf16.msra.mxu0 %v162_v6 }
  0x19   :  { %151 = vmatmul.mubr.msk.bf16.vlgmr.msra.gmra.mrb[0].mxu0 %vm63_vm1, %v14_v8 }
  0xec   :  { %v101_v9 = vpop.f32.mrb[0].mxu0 }
  0xed   :  { %v107_v10 = vpack.c.bf16 %v101_v9, %v101_v9  ;;  %v152_v11 = vpop.f32.mrb[1].mxu0 }
  0xee   :  { %v104_v12 = vpop.f32.mrb[2].mxu0 }
  0xef   :  { %v153_v13 = vpop.f32.mrb[3].mxu0  ;;  %109 = vst.msk [vmem:[#allocation2] sm:$0xf] %vm108_vm2, %v107_v10 }
  0xf0   :  { %174 = shalt.err (!%p171_p4)
}
  0xf1   :  { %s175_s26 = scalar_lea.hbm %s240_s2, 64 }
  0xf2   :  { %p176_p5 = scmp.ne.s32.totalorder %s240_s2, %s175_s26  ;;  %p179_p6 = scmp.lt.u32.totalorder %s175_s26, %s240_s2 }
  0xf4   :  { %p181_p7 = pnand %p179_p6, %p176_p5 }
  0xf6   :  { %184 = shalt.err (!%p181_p7)
}
  0xf7   :  { %119 = dma.vmem_to_hbm [thread:$0]  %s117_s24, 64, %s240_s2, [#allocation3]  }
  0xf8   :  { %185 = dma.done.wait [#allocation3], 64  }
  0xf9   :  { %186 = vsyncadd [#allocation3], 4294967232 }
  0xfa   :  { %123 = vsyncpa [#allocation3], 1 }

</bundles_post_ra>
